<compile_context>
chip_gen: v7x
topology: tpu7x:2x2x1
jax: 0.10.0
libtpu: 0.0.40
codegen_flags: <defaults>
</compile_context>

<pallas_src>
import functools

import jax
import jax.numpy as jnp
from jax.experimental import pallas as pl
from jax.experimental.pallas import tpu as pltpu


# ----------------------------------------------------------------------------
# Kernel: one row-tile of x through the composed down/up projections.
# ----------------------------------------------------------------------------
def low_rank_adapter_kernel(
    x_ref,      # (bm, D)  input rows        (storage dtype, e.g. f32 / bf16)
    wd_ref,     # (D, d)   composed W_down   (storage dtype)
    bd_ref,     # (1, d)   down bias         (f32)
    wu_ref,     # (d, D)   composed W_up     (storage dtype)
    bu_ref,     # (1, D)   up bias           (f32)
    o_ref,      # (bm, D)  output rows
):
    # Down projection on the MXU, f32 accumulation.
    z = jnp.dot(x_ref[...], wd_ref[...], preferred_element_type=jnp.float32)
    z = z + bd_ref[...].astype(jnp.float32)

    # Swish / SiLU in f32 (EUP sigmoid + VPU multiply).
    z = z * jax.nn.sigmoid(z)

    # Up projection on the MXU, f32 accumulation.
    out = jnp.dot(z.astype(wu_ref.dtype), wu_ref[...],
                  preferred_element_type=jnp.float32)
    out = out + bu_ref[...].astype(jnp.float32)

    o_ref[...] = out.astype(o_ref.dtype)


# ----------------------------------------------------------------------------
# Tile-size / VMEM-budget selection (per TPU generation).
# ----------------------------------------------------------------------------
def _vmem_capacity_bytes():
    try:
        return int(pltpu.get_tpu_info().vmem_capacity_bytes)
    except Exception:
        return 64 << 20  # conservative (v7x per-TC VMEM)


def _pick_block_m(M, D, d, x_itemsize):
    """Largest multiple-of-256 row tile whose double-buffered in/out tiles plus
    the composed weights fit in ~half of VMEM; capped at 2048."""
    budget = _vmem_capacity_bytes() // 2
    const_bytes = 2 * (2 * D * d * x_itemsize) + 2 * (d + D) * 4  # weights + biases (dbl-buf)
    avail = max(budget - const_bytes, 0)
    # x tile + out tile, each double-buffered: 4 * bm * D * itemsize
    bm = avail // max(4 * D * x_itemsize, 1)
    bm = (bm // 256) * 256
    bm = max(256, min(2048, bm))
    # Keep >= 2 grid steps on large inputs so v7x can shard rows across its 2 TCs.
    if M > 512 and bm >= M:
        bm = max(256, ((M + 1) // 2 + 255) // 256 * 256)
    return int(bm)


# ----------------------------------------------------------------------------
# Wrapper.
# ----------------------------------------------------------------------------
@functools.partial(jax.jit, static_argnames=("block_m", "vmem_limit_bytes"))
def _low_rank_adapter_impl(x, params, block_m, vmem_limit_bytes):
    B, S, D = x.shape
    M = B * S
    x2 = x.reshape(M, D)

    dwl, dwr, db = params["down_w_left"], params["down_w_right"], params["down_b"]
    uwl, uwr, ub = params["up_w_left"], params["up_w_right"], params["up_b"]
    d = dwr.shape[1]   # down_sample_size

    # Hoisted low-rank composition (tiny: D*r + r*d elements). Composed in f32,
    # then cast to the activation dtype so the MXU streams bf16 when x is bf16.
    w_down = jnp.dot(dwl.astype(jnp.float32), dwr.astype(jnp.float32)).astype(x.dtype)
    w_up = jnp.dot(uwl.astype(jnp.float32), uwr.astype(jnp.float32)).astype(x.dtype)
    db2 = db.reshape(1, d).astype(jnp.float32)
    ub2 = ub.reshape(1, D).astype(jnp.float32)

    bm = min(block_m, M)
    grid = (pl.cdiv(M, bm),)

    out2 = pl.pallas_call(
        low_rank_adapter_kernel,
        out_shape=jax.ShapeDtypeStruct((M, D), x.dtype),
        grid_spec=pltpu.PrefetchScalarGridSpec(
            num_scalar_prefetch=0,
            grid=grid,
            in_specs=[
                pl.BlockSpec((bm, D), lambda i: (i, 0)),   # x rows (streamed)
                pl.BlockSpec((D, d), lambda i: (0, 0)),    # composed W_down (resident)
                pl.BlockSpec((1, d), lambda i: (0, 0)),    # down bias
                pl.BlockSpec((d, D), lambda i: (0, 0)),    # composed W_up (resident)
                pl.BlockSpec((1, D), lambda i: (0, 0)),    # up bias
            ],
            out_specs=pl.BlockSpec((bm, D), lambda i: (i, 0)),
        ),
        compiler_params=pltpu.CompilerParams(
            dimension_semantics=("parallel",),
            vmem_limit_bytes=vmem_limit_bytes,
        ),
    )(x2, w_down, db2, w_up, ub2)

    return out2.reshape(B, S, D)


def low_rank_adapter(x, params, block_m=None):
    """x: (batch, seq, input_dim).  params: dict of low-rank factors + biases."""
    B, S, D = x.shape
    M = B * S
    d = params["down_w_right"].shape[1]
    itemsize = jnp.dtype(x.dtype).itemsize
    if block_m is None:
        block_m = _pick_block_m(M, D, d, itemsize)
    # Scoped VMEM limit: enough for the double-buffered pipeline, capped below
    # physical capacity (v7x: 64 MiB).
    vmem_limit = min(int(_vmem_capacity_bytes() * 3 // 4),
                     max(32 << 20,
                         8 * min(block_m, M) * D * itemsize + (4 << 20)))
    return _low_rank_adapter_impl(x, params, block_m, vmem_limit)


# ----------------------------------------------------------------------------
# Parameter init + pure-JAX reference.
# ----------------------------------------------------------------------------
def init_params(key, input_dim, reduction_factor, rank):
    """Deterministic synthetic init (glorot-ish scaling); no checkpoint load."""
    down_dim = input_dim // reduction_factor
    ks = jax.random.split(key, 6)

    def glorot(k, shape):
        fan_in, fan_out = shape[0], shape[-1]
        lim = jnp.sqrt(6.0 / (fan_in + fan_out))
        return jax.random.uniform(k, shape, jnp.float32, -lim, lim)

    return {
        "down_w_left":  glorot(ks[0], (input_dim, rank)),
        "down_w_right": glorot(ks[1], (rank, down_dim)),
        "down_b":       jnp.zeros((down_dim,), jnp.float32),
        "up_w_left":    glorot(ks[2], (down_dim, rank)),
        "up_w_right":   glorot(ks[3], (rank, input_dim)),
        "up_b":         jnp.zeros((input_dim,), jnp.float32),
    }


def _reference(x, p):
    w_down = p["down_w_left"] @ p["down_w_right"]
    z = x @ w_down + p["down_b"]
    z = z * jax.nn.sigmoid(z)
    w_up = p["up_w_left"] @ p["up_w_right"]
    return z @ w_up + p["up_b"]


if __name__ == "__main__":
    # Config: input_dim=32, reduction_factor=4 -> down_sample_size=8,
    # low_rank_rank=1, non_linearity="swish", track_z=False.
    # TODO(synk): track_z (stashing the intermediate z on the module) is a
    # stateful side effect with no functional-kernel equivalent; omitted.
    B, S, H = 2, 8, 32
    reduction_factor, rank = 4, 1

    key = jax.random.PRNGKey(0)
    kx, kp = jax.random.split(key)
    x = jax.random.normal(kx, (B, S, H), jnp.float32)
    params = init_params(kp, H, reduction_factor, rank)

    out = low_rank_adapter(x, params)
    out = jax.block_until_ready(out)

    ref = _reference(x, params)
    assert out.shape == (B, S, H)
    assert jnp.allclose(out, ref, atol=1e-5, rtol=1e-5), "mismatch vs reference"
    print("KERNEL_OK")
</pallas_src>

<mosaic_0001>
module attributes {stable_mosaic.version = 11 : i64} {
  func.func @low_rank_adapter_kernel(%arg0: i32, %arg1: memref<16x32xf32, #tpu.memory_space<vmem>>, %arg2: memref<32x8xf32, #tpu.memory_space<vmem>>, %arg3: memref<1x8xf32, #tpu.memory_space<vmem>>, %arg4: memref<8x32xf32, #tpu.memory_space<vmem>>, %arg5: memref<1x32xf32, #tpu.memory_space<vmem>>, %arg6: memref<16x32xf32, #tpu.memory_space<vmem>>) attributes {dimension_semantics = [#tpu.dimension_semantics<parallel>], iteration_bounds = array<i64: 1>, scalar_prefetch = 0 : i64, scratch_operands = 0 : i64, tpu.core_type = #tpu.core_type<tc>, window_params = [{transform_indices = @transform_0, window_bounds = array<i64: 16, 32>}, {pipeline_mode = #tpu.pipeline_mode<synchronous>, transform_indices = @transform_1, window_bounds = array<i64: 32, 8>}, {pipeline_mode = #tpu.pipeline_mode<synchronous>, transform_indices = @transform_2, window_bounds = array<i64: 1, 8>}, {pipeline_mode = #tpu.pipeline_mode<synchronous>, transform_indices = @transform_3, window_bounds = array<i64: 8, 32>}, {pipeline_mode = #tpu.pipeline_mode<synchronous>, transform_indices = @transform_4, window_bounds = array<i64: 1, 32>}, {transform_indices = @transform_5, window_bounds = array<i64: 16, 32>}]} {
    %c0 = arith.constant 0 : index
    %c0_0 = arith.constant 0 : index
    %0 = vector.load %arg1[%c0, %c0_0] : memref<16x32xf32, #tpu.memory_space<vmem>>, vector<16x32xf32>
    %c0_1 = arith.constant 0 : index
    %c0_2 = arith.constant 0 : index
    %1 = vector.load %arg2[%c0_1, %c0_2] : memref<32x8xf32, #tpu.memory_space<vmem>>, vector<32x8xf32>
    %cst = arith.constant dense<0.000000e+00> : vector<16x8xf32>
    %2 = tpu.matmul %0, %1, %cst {dimension_numbers = #tpu.dot_dimension_numbers<[1], [0], [0], [1], [0, 0, 1, 1], [], []>} : vector<16x32xf32>, vector<32x8xf32>, vector<16x8xf32> -> vector<16x8xf32>
    %c0_3 = arith.constant 0 : index
    %c0_4 = arith.constant 0 : index
    %3 = vector.load %arg3[%c0_3, %c0_4] : memref<1x8xf32, #tpu.memory_space<vmem>>, vector<1x8xf32>
    %4 = vector.broadcast %3 : vector<1x8xf32> to vector<16x8xf32>
    %5 = arith.addf %2, %4 : vector<16x8xf32>
    %6 = arith.negf %5 : vector<16x8xf32>
    %7 = math.exp %6 : vector<16x8xf32>
    %cst_5 = arith.constant 1.000000e+00 : f32
    %8 = vector.broadcast %cst_5 : f32 to vector<16x8xf32>
    %9 = arith.addf %8, %7 : vector<16x8xf32>
    %10 = arith.divf %8, %9 : vector<16x8xf32>
    %11 = arith.mulf %5, %10 : vector<16x8xf32>
    %c0_6 = arith.constant 0 : index
    %c0_7 = arith.constant 0 : index
    %12 = vector.load %arg4[%c0_6, %c0_7] : memref<8x32xf32, #tpu.memory_space<vmem>>, vector<8x32xf32>
    %cst_8 = arith.constant dense<0.000000e+00> : vector<16x32xf32>
    %13 = tpu.matmul %11, %12, %cst_8 {dimension_numbers = #tpu.dot_dimension_numbers<[1], [0], [0], [1], [0, 0, 1, 1], [], []>} : vector<16x8xf32>, vector<8x32xf32>, vector<16x32xf32> -> vector<16x32xf32>
    %c0_9 = arith.constant 0 : index
    %c0_10 = arith.constant 0 : index
    %14 = vector.load %arg5[%c0_9, %c0_10] : memref<1x32xf32, #tpu.memory_space<vmem>>, vector<1x32xf32>
    %15 = vector.broadcast %14 : vector<1x32xf32> to vector<16x32xf32>
    %16 = arith.addf %13, %15 : vector<16x32xf32>
    %c0_11 = arith.constant 0 : index
    %c0_12 = arith.constant 0 : index
    %17 = vector.load %arg6[%c0_11, %c0_12] : memref<16x32xf32, #tpu.memory_space<vmem>>, vector<16x32xf32>
    tpu.vector_store %arg6[%c0_11, %c0_12], %16 {strides = array<i32>} : memref<16x32xf32, #tpu.memory_space<vmem>>, vector<16x32xf32>,
    return
  }
  func.func @transform_0(%arg0: i32) -> (i32, i32) {
    %c0_i32 = arith.constant 0 : i32
    %c0_i32_0 = arith.constant 0 : i32
    return %arg0, %c0_i32 : i32, i32
  }
  func.func @transform_1(%arg0: i32) -> (i32, i32) {
    %c0_i32 = arith.constant 0 : i32
    %c0_i32_0 = arith.constant 0 : i32
    %c0_i32_1 = arith.constant 0 : i32
    return %c0_i32, %c0_i32_0 : i32, i32
  }
  func.func @transform_2(%arg0: i32) -> (i32, i32) {
    %c0_i32 = arith.constant 0 : i32
    %c0_i32_0 = arith.constant 0 : i32
    %c0_i32_1 = arith.constant 0 : i32
    return %c0_i32, %c0_i32_0 : i32, i32
  }
  func.func @transform_3(%arg0: i32) -> (i32, i32) {
    %c0_i32 = arith.constant 0 : i32
    %c0_i32_0 = arith.constant 0 : i32
    %c0_i32_1 = arith.constant 0 : i32
    return %c0_i32, %c0_i32_0 : i32, i32
  }
  func.func @transform_4(%arg0: i32) -> (i32, i32) {
    %c0_i32 = arith.constant 0 : i32
    %c0_i32_0 = arith.constant 0 : i32
    %c0_i32_1 = arith.constant 0 : i32
    return %c0_i32, %c0_i32_0 : i32, i32
  }
  func.func @transform_5(%arg0: i32) -> (i32, i32) {
    %c0_i32 = arith.constant 0 : i32
    %c0_i32_0 = arith.constant 0 : i32
    return %arg0, %c0_i32 : i32, i32
  }
}

</mosaic_0001>

<bundles_post_ra>
// kernel: _low_rank_adapter_impl.1
= control target key start
LH: loop header
LB: loop body
LE: loop exit
PB: predicated region body
PF: predicated region fallthrough
CT: control target
= control target key end

     0   :  { %vm34_vm0 = vcmask 261120   ;;  %s390_s0 = inlined_call_operand.vmem [shape: f32[16,32], index: 0, kind: input, shape index: {}]   ;;  %s391_s1 = inlined_call_operand.vmem [shape: f32[32,8], index: 1, kind: input, shape index: {}]   ;;  %s392_s2 = inlined_call_operand.vmem [shape: f32[1,8], index: 2, kind: input, shape index: {}]   ;;  %s393_s3 = inlined_call_operand.vmem [shape: f32[8,32], index: 3, kind: input, shape index: {}]   ;;  %s394_s4 = inlined_call_operand.vmem [shape: f32[1,32], index: 4, kind: input, shape index: {}]   ;;  %s395_s5 = inlined_call_operand.hbm [shape: f32[16,32], index: 5, kind: output, shape index: {}]  }
   0x1   :  { %v23_v0 = vld [vmem:[%s391_s1] sm:$0xff]  ;;  %v24_v1 = vld [vmem:[%s391_s1 + $0x8] sm:$0xff]  ;;  %v25_v2 = vld [vmem:[%s391_s1 + $0x10] sm:$0xff] }
   0x2   :  { %v271_v3 = vpack.c.bf16 %v24_v1, %v23_v0  ;;  %v26_v4 = vld [vmem:[%s391_s1 + $0x18] sm:$0xff]  ;;  %v21_v5 = vld [vmem:[%s390_s0] sm:$0xff] }
   0x3   :  { %v275_v6 = vpack.c.bf16 %v26_v4, %v25_v2  ;;  %263 = vmatprep.mubr.msk.f32.mxu0 %vm34_vm0, %v21_v5 }
   0x4   :  { %10 = vsyncpa [#allocation3], 0  ;;  %272 = vmatprep.subr.bf16.mxu0 %v271_v3  ;;  %v22_v7 = vld [vmem:[%s390_s0 + $0x8] sm:$0xff]  ;;  %v130_v8 = vld [vmem:[%s393_s3] sm:$0xff]  ;;  %vm138_vm1 = vcmask 64512   ;;  %s314_s3 = smov [#allocation2]  }
   0x5   :  { %274 = vmatpush3.bf16.msra.mxu0 %v271_v3  ;;  %266 = vmatprep.subr.mxu1 %v130_v8  ;;  %v238_v9 = vld [vmem:[%s392_s2] ss:$0 sm:$0xff]  ;;  %s227_s8 = sshll.u32 %s314_s3, 4  ;;  %s228_s8 = int_to_ptr.vmem [resolvable:$true] %s227_s8 }
   0x6   :  { %276 = vmatprep.subr.bf16.mxu0 %v275_v6  ;;  %267 = vmatpush3.msra.mxu1 %v130_v8  ;;  %v243_v24 = vld [vmem:[%s394_s4] ss:$0 sm:$0xff]  ;;  %s290_s9 = scalar_lea.vmem %s228_s8, 256  ;;  %p295_p1 = scmp.lt.s32.totalorder %s228_s8, %s228_s8 }
   0x7   :  { %p291_p0 = scmp.ne.s32.totalorder %s228_s8, %s290_s9  ;;  %p296_p2 = scmp.lt.s32.totalorder %s290_s9, %s290_s9 }
   0x9   :  { %278 = vmatpush3.bf16.msra.mxu0 %v275_v6  ;;  %p297_p3 = por %p296_p2, %p295_p1 }
   0xb   :  { %p298_p4 = pnand %p297_p3, %p291_p0 }
   0xc   :  { %264 = vmatmul.mubr.msk.f32.vlgmr.msra.gmra.mrb[0].mxu0 %vm34_vm0, %v22_v7 }
  0xdf   :  { %v265_v10 = vpop.f32.mrb[0].mxu0 }
  0xe0   :  { %v113_v11 = vadd.f32 %v265_v10, %v238_v9  ;;  %v107_v12 = vpop.f32.mrb[1].mxu0 }
  0xe1   :  { %v108_v13 = vadd.f32 %v238_v9, %v107_v12 }
  0xe2   :  { %v242_v14 = vmul.f32 -1.442695, %v113_v11 }
  0xe3   :  { %v241_v15 = vmul.f32 -1.442695, %v108_v13 }
  0xe4   :  { %282 = vpow2.f32 %v242_v14 }
  0xe5   :  { %284 = vpow2.f32 %v241_v15 }
  0xee   :  { %v283_v16 = vpop.eup %282 }
  0xef   :  { %v285_v17 = vpop.eup %284  ;;  %v123_v18 = vadd.f32 1.0, %v283_v16 }
  0xf0   :  { %v122_v19 = vadd.f32 1.0, %v285_v17 }
  0xf1   :  { %286 = vrcp.f32 %v123_v18 }
  0xf2   :  { %288 = vrcp.f32 %v122_v19 }
  0xfb   :  { %v287_v20 = vpop.eup %286 }
  0xfc   :  { %v289_v21 = vpop.eup %288  ;;  %v129_v23 = vmul.f32 %v287_v20, %v113_v11 }
  0xfd   :  { %v128_v22 = vmul.f32 %v289_v21, %v108_v13 }
  0xff   :  { %268 = vmatprep.mubr.msk.f32.mxu1 %vm138_vm1, %v128_v22 }
 0x100   :  { %269 = vmatmul.mubr.msk.f32.vlgmr.msra.gmra.mrb[0].mxu1 %vm138_vm1, %v129_v23 }
 0x1d3   :  { %v270_v25 = vpop.f32.mrb[0].mxu1 }
 0x1d4   :  { %v217_v26 = vadd.f32 %v270_v25, %v243_v24  ;;  %v211_v27 = vpop.f32.mrb[1].mxu1 }
 0x1d5   :  { %v212_v28 = vadd.f32 %v243_v24, %v211_v27 }
 0x1d6   :  { %221 = vst.msk [vmem:[#allocation2 + $0x8] sm:$0xff] %vm34_vm0, %v217_v26 }
 0x1d7   :  { %220 = vst.msk [vmem:[#allocation2] sm:$0xff] %vm34_vm0, %v212_v28 }
 0x1d8   :  { %301 = shalt.err (!%p298_p4)
}
 0x1d9   :  { %s302_s11 = scalar_lea.hbm %s395_s5, 256 }
 0x1da   :  { %p303_p5 = scmp.ne.s32.totalorder %s395_s5, %s302_s11  ;;  %p306_p6 = scmp.lt.u32.totalorder %s302_s11, %s395_s5 }
 0x1dc   :  { %p308_p7 = pnand %p306_p6, %p303_p5 }
 0x1de   :  { %311 = shalt.err (!%p308_p7)
}
 0x1df   :  { %s315_s16 = smov 128   ;;  %s316_s17 = smov 8  }
 0x1e0   :  { %233 = dma.vmem_to_hbm [thread:$0]  %s228_s8, 256, %s395_s5, [#allocation3], %s315_s16, %s315_s16, %s316_s17  }
 0x1e1   :  { %312 = dma.done.wait [#allocation3], 256  }
 0x1e2   :  { %313 = vsyncadd [#allocation3], 4294967040 }
 0x1e3   :  { %237 = vsyncpa [#allocation3], 1 }

</bundles_post_ra>
